<compile_context>
chip_gen: v7x
topology: tpu7x:2x2x1
jax: 0.10.0
libtpu: 0.0.40
codegen_flags: <defaults>
</compile_context>

<pallas_src>
import math

import jax
import jax.numpy as jnp
from jax import lax
from jax.experimental import pallas as pl
from jax.experimental.pallas import tpu as pltpu


_LANE_CHOICES = (512, 256, 128)     # lane-dense last dims to try (multiples of 128)
_TARGET_BYTES = 4 * 1024 * 1024     # ~4 MiB of the widest input stream per block


def _round_up(x, m):
    return ((x + m - 1) // m) * m


def _cdiv(a, b):
    return -(-a // b)


def _ipow(x, e):
    """x ** e; exact square-and-multiply for small non-negative integer e."""
    e = float(e)
    if e.is_integer() and 0 <= e <= 64:
        n = int(e)
        if n == 0:
            return jnp.ones_like(x)
        acc = None
        base = x
        while n:
            if n & 1:
                acc = base if acc is None else acc * base
            n >>= 1
            if n:
                base = base * base
        return acc
    # non-integer exponent: jnp.power costs ~2 EUP ops/element (exp + log)
    return jnp.power(x, jnp.float32(e))


def _make_kernel(alpha, gamma, has_grad, rows, tile_r, lanes):
    """Per-block gaussian focal loss + per-lane partial reductions.

    Each grid step writes one (3, lanes) slab:
      row 0 = per-lane sum(pos_loss), row 1 = per-lane sum(neg_loss),
      row 2 = per-lane count of positives.
    """
    needs_mask = (rows % tile_r) != 0   # static: only if the last block is ragged

    def _compute(pred_ref, tgt_ref, grad_ref, out_ref):
        p = pred_ref[...].astype(jnp.float32)
        t = tgt_ref[...].astype(jnp.float32)
        eps = jnp.float32(1e-10)
        one = jnp.float32(1.0)
        zero = jnp.float32(0.0)

        pos = t == one
        neg = t < one

        # Single-log / single-pow formulation (pos/neg branches are disjoint).
        # Identical to the torch math for pred in [0, 1]; only differs on
        # degenerate inputs where torch's masked-out branch would yield NaN*0.
        log_val = jnp.log(jnp.where(pos, p + eps, (one - p) + eps))
        pow_val = _ipow(jnp.where(pos, one - p, p), alpha)
        neg_w = _ipow(one - t, gamma)
        w = jnp.where(pos, one, jnp.where(neg, neg_w, zero))
        loss = -log_val * pow_val * w
        if has_grad:
            loss = loss * grad_ref[...].astype(jnp.float32)

        if needs_mask:
            # Ragged final block: rows >= `rows` hold garbage (possibly
            # NaN-producing).  jnp.where (select) does not propagate NaN from
            # the unselected branch, so zeroing here fully sanitizes them.
            # ~3 VPU ops per vreg -> free filler under the DMA.
            row = (pl.program_id(0) * tile_r
                   + lax.broadcasted_iota(jnp.int32, (tile_r, lanes), 0))
            valid = row < rows
            loss = jnp.where(valid, loss, zero)
            pos = jnp.logical_and(pos, valid)

        # Sublane-only reduction; cross-lane/cross-grid reduce finishes in JAX.
        pos_lane = jnp.sum(jnp.where(pos, loss, zero), axis=0, keepdims=True)
        neg_lane = jnp.sum(jnp.where(pos, zero, loss), axis=0, keepdims=True)
        npos_lane = jnp.sum(pos.astype(jnp.float32), axis=0, keepdims=True)
        out_ref[0:1, :] = pos_lane
        out_ref[1:2, :] = neg_lane
        out_ref[2:3, :] = npos_lane

    if has_grad:
        def kernel(pred_ref, tgt_ref, grad_ref, out_ref):
            _compute(pred_ref, tgt_ref, grad_ref, out_ref)
    else:
        def kernel(pred_ref, tgt_ref, out_ref):
            _compute(pred_ref, tgt_ref, None, out_ref)
    return kernel


def _jax_partial_sums(pred, target, grad, alpha, gamma):
    """Torch-faithful pos/neg/npos sums in plain JAX (tiny tails / fallback)."""
    p = pred.astype(jnp.float32)
    t = target.astype(jnp.float32)
    g = jnp.float32(1.0) if grad is None else grad.astype(jnp.float32)
    eps = jnp.float32(1e-10)
    pos = (t == 1.0).astype(jnp.float32)
    neg = (t < 1.0).astype(jnp.float32)
    neg_w = jnp.power(1.0 - t, jnp.float32(gamma))
    pos_loss = -jnp.log(p + eps) * jnp.power(1.0 - p, jnp.float32(alpha)) * pos * g
    neg_loss = (-jnp.log(1.0 - p + eps) * jnp.power(p, jnp.float32(alpha))
                * neg_w * neg * g)
    return pos_loss.sum(), neg_loss.sum(), pos.sum()


class GaussianFocalLoss:
    """JAX/Pallas port of hat.models.losses.focal_loss.GaussianFocalLoss (forward)."""

    def __init__(self, alpha=2.0, gamma=4.0, loss_weight=1.0):
        self.alpha = float(alpha)
        self.gamma = float(gamma)
        self.loss_weight = float(loss_weight)

    # ---- layout planning (no data movement) --------------------------------
    @staticmethod
    def _plan(total, itemsizes):
        """Returns (lanes, main, rows, tile_r, grid)."""
        lanes = next((l for l in _LANE_CHOICES if l <= total and total % l == 0), 128)
        main = (total // lanes) * lanes
        if main == 0:
            return lanes, 0, 0, 0, 0
        rows = main // lanes

        max_item = max(itemsizes)
        # min sublane tile per dtype: f32 -> 8, bf16/f16 -> 16, int8/fp8 -> 32
        sublane = max(8 * max(1, 4 // it) for it in itemsizes)

        if rows <= sublane:
            return lanes, main, rows, rows, 1      # one full-extent block

        # dtype-aware rows: ~4 MiB of the widest stream per block
        tile_r = max(sublane,
                     (_TARGET_BYTES // (lanes * max_item)) // sublane * sublane)
        # guarantee >= 2 grid steps so the parallel axis can use v7x's 2nd core
        tile_r = min(tile_r, _round_up(_cdiv(rows, 2), sublane))
        grid = _cdiv(rows, tile_r)
        return lanes, main, rows, tile_r, grid

    # ---- forward ------------------------------------------------------------
    def __call__(self, logits, labels, grad_tensor=None):
        pred = jnp.asarray(logits)
        target = jnp.asarray(labels)
        grad = None if grad_tensor is None else jnp.asarray(grad_tensor)

        total = math.prod(pred.shape)
        itemsizes = [jnp.dtype(pred.dtype).itemsize,
                     jnp.dtype(target.dtype).itemsize]
        if grad is not None:
            itemsizes.append(jnp.dtype(grad.dtype).itemsize)

        lanes, main, rows, tile_r, grid = self._plan(total, itemsizes)

        pred_f = pred.reshape(-1)
        tgt_f = target.reshape(-1)
        grad_f = None if grad is None else grad.reshape(-1)

        pos_sum = jnp.float32(0.0)
        neg_sum = jnp.float32(0.0)
        npos = jnp.float32(0.0)

        if main > 0:
            def head(x):
                # No pad: a contiguous reshape is free when `lanes` divides the
                # element count; only rare unaligned shapes take a prefix slice.
                flat = x if main == total else x[:main]
                return flat.reshape(rows, lanes)

            args = [head(pred_f), head(tgt_f)]
            in_specs = [pl.BlockSpec((tile_r, lanes), lambda i: (i, 0)),
                        pl.BlockSpec((tile_r, lanes), lambda i: (i, 0))]
            if grad is not None:
                args.append(head(grad_f))
                in_specs.append(pl.BlockSpec((tile_r, lanes), lambda i: (i, 0)))

            kernel = _make_kernel(self.alpha, self.gamma, grad is not None,
                                  rows, tile_r, lanes)

            # Explicit VMEM ceiling: double-buffered input footprint + headroom,
            # above v5e's 16 MiB scoped default, below v7x's 64 MiB/TC physical.
            stream_bytes = tile_r * lanes * sum(itemsizes)
            vmem_limit = int(min(50 * 2**20,
                                 max(16 * 2**20, 2 * stream_bytes + 8 * 2**20)))
            cost = pl.CostEstimate(
                flops=20 * main,
                transcendentals=main,
                bytes_accessed=main * sum(itemsizes) + grid * 3 * lanes * 4)

            partials = pl.pallas_call(
                kernel,
                out_shape=jax.ShapeDtypeStruct((grid, 3, lanes), jnp.float32),
                grid=(grid,),
                in_specs=in_specs,
                out_specs=pl.BlockSpec((None, 3, lanes), lambda i: (i, 0, 0)),
                compiler_params=pltpu.CompilerParams(
                    dimension_semantics=("parallel",),
                    vmem_limit_bytes=vmem_limit),
                cost_estimate=cost,
            )(*args)

            pos_sum = pos_sum + jnp.sum(partials[:, 0, :])
            neg_sum = neg_sum + jnp.sum(partials[:, 1, :])
            npos = npos + jnp.sum(partials[:, 2, :])

        if main < total:
            # <128-element lane remainder (or tiny inputs): pure-JAX epilogue.
            tp, tn, tc = _jax_partial_sums(
                pred_f[main:], tgt_f[main:],
                None if grad is None else grad_f[main:],
                self.alpha, self.gamma)
            pos_sum = pos_sum + tp
            neg_sum = neg_sum + tn
            npos = npos + tc

        denom = jnp.where(npos > 0, npos, jnp.float32(1.0))
        loss = jnp.where(npos > 0, (pos_sum + neg_sum) / denom, neg_sum)
        return jnp.float32(self.loss_weight) * loss


# ---- pure-JAX, torch-faithful reference (correctness check only) ---------------
def _reference(mod, logits, labels, grad_tensor=None):
    pred = jnp.asarray(logits, jnp.float32)
    target = jnp.asarray(labels, jnp.float32)
    grad = (jnp.ones_like(pred) if grad_tensor is None
            else jnp.asarray(grad_tensor, jnp.float32))
    eps = 1e-10
    pos_pos = (target == 1.0).astype(jnp.float32)
    neg_pos = (target < 1.0).astype(jnp.float32)
    neg_weights = jnp.power(1.0 - target, mod.gamma)
    pos_loss = -jnp.log(pred + eps) * jnp.power(1.0 - pred, mod.alpha) * pos_pos * grad
    neg_loss = (-jnp.log(1.0 - pred + eps) * jnp.power(pred, mod.alpha)
                * neg_weights * neg_pos * grad)
    nums_pos = pos_pos.sum()
    p = pos_loss.sum()
    n = neg_loss.sum()
    loss = jnp.where(nums_pos == 0, n,
                     (p + n) / jnp.where(nums_pos == 0, 1.0, nums_pos))
    return mod.loss_weight * loss


if __name__ == "__main__":
    key = jax.random.PRNGKey(0)
    k1, k2, k3, k4 = jax.random.split(key, 4)

    B, C, H, W = 2, 4, 16, 16
    # heatmap-style predictions in (0, 1)
    logits = jax.nn.sigmoid(jax.random.normal(k1, (B, C, H, W), jnp.float32))
    # gaussian target: a few exact-1 peaks, everything else strictly < 1
    labels = jax.random.uniform(k2, (B, C, H, W), jnp.float32) * 0.98
    labels = jnp.where(jax.random.uniform(k3, (B, C, H, W)) < 0.02, 1.0, labels)
    grad = jax.random.uniform(k4, (B, C, H, W), jnp.float32) + 0.5

    mod = GaussianFocalLoss()  # alpha=2.0, gamma=4.0, loss_weight=1.0

    # default path (grad_tensor=None)
    out = jax.block_until_ready(mod(logits, labels))
    ref = jax.block_until_ready(_reference(mod, logits, labels))
    assert jnp.allclose(out, ref, rtol=1e-4, atol=1e-6), (out, ref)

    # explicit grad_tensor path
    out_g = jax.block_until_ready(mod(logits, labels, grad))
    ref_g = jax.block_until_ready(_reference(mod, logits, labels, grad))
    assert jnp.allclose(out_g, ref_g, rtol=1e-4, atol=1e-6), (out_g, ref_g)

    # no-positive-sample branch (loss = neg_loss sum)
    labels0 = jnp.minimum(labels, 0.9)
    out0 = jax.block_until_ready(mod(logits, labels0))
    ref0 = jax.block_until_ready(_reference(mod, logits, labels0))
    assert jnp.allclose(out0, ref0, rtol=1e-4, atol=1e-6), (out0, ref0)

    # multi-block path (grid >= 2), aligned shape -> no pad, no mask, no tail
    k5, k6, k7 = jax.random.split(jax.random.PRNGKey(1), 3)
    big_shape = (2, 4, 256, 256)
    logits_b = jax.nn.sigmoid(jax.random.normal(k5, big_shape, jnp.float32))
    labels_b = jax.random.uniform(k6, big_shape, jnp.float32) * 0.98
    labels_b = jnp.where(jax.random.uniform(k7, big_shape) < 0.001, 1.0, labels_b)
    out_b = jax.block_until_ready(mod(logits_b, labels_b))
    ref_b = jax.block_until_ready(_reference(mod, logits_b, labels_b))
    assert jnp.allclose(out_b, ref_b, rtol=5e-4, atol=1e-5), (out_b, ref_b)

    # unaligned shape -> ragged last block (in-kernel mask) + <128-elem JAX tail
    k8, k9, k10 = jax.random.split(jax.random.PRNGKey(2), 3)
    odd_shape = (3, 5, 17, 19)  # 4845 elements
    logits_u = jax.nn.sigmoid(jax.random.normal(k8, odd_shape, jnp.float32))
    labels_u = jax.random.uniform(k9, odd_shape, jnp.float32) * 0.98
    labels_u = jnp.where(jax.random.uniform(k10, odd_shape) < 0.02, 1.0, labels_u)
    out_u = jax.block_until_ready(mod(logits_u, labels_u))
    ref_u = jax.block_until_ready(_reference(mod, logits_u, labels_u))
    assert jnp.allclose(out_u, ref_u, rtol=5e-4, atol=1e-5), (out_u, ref_u)

    # bf16 inputs -> native-dtype DMA, dtype-aware sublane/tile sizing
    k11, k12, k13 = jax.random.split(jax.random.PRNGKey(3), 3)
    bf_shape = (2, 4, 64, 64)
    logits_h = jax.nn.sigmoid(jax.random.normal(k11, bf_shape, jnp.float32)).astype(jnp.bfloat16)
    labels_h = (jax.random.uniform(k12, bf_shape, jnp.float32) * 0.98).astype(jnp.bfloat16)
    labels_h = jnp.where(jax.random.uniform(k13, bf_shape) < 0.01,
                         jnp.bfloat16(1.0), labels_h)
    out_h = jax.block_until_ready(mod(logits_h, labels_h))
    ref_h = jax.block_until_ready(_reference(mod, logits_h, labels_h))
    assert jnp.allclose(out_h, ref_h, rtol=1e-3, atol=1e-5), (out_h, ref_h)

    print("KERNEL_OK")
</pallas_src>

<mosaic_0001>
module attributes {stable_mosaic.version = 11 : i64} {
  func.func @kernel(%arg0: i32, %arg1: memref<4x512xf32, #tpu.memory_space<vmem>>, %arg2: memref<4x512xf32, #tpu.memory_space<vmem>>, %arg3: memref<1x3x512xf32, #tpu.memory_space<vmem>>) attributes {dimension_semantics = [#tpu.dimension_semantics<parallel>], iteration_bounds = array<i64: 1>, scalar_prefetch = 0 : i64, scratch_operands = 0 : i64, tpu.core_type = #tpu.core_type<tc>, window_params = [{transform_indices = @transform_0, window_bounds = array<i64: 4, 512>}, {transform_indices = @transform_1, window_bounds = array<i64: 4, 512>}, {transform_indices = @transform_2, window_bounds = array<i64: 1, 3, 512>}]} {
    %c0 = arith.constant 0 : index
    %c0_0 = arith.constant 0 : index
    %0 = vector.load %arg1[%c0, %c0_0] : memref<4x512xf32, #tpu.memory_space<vmem>>, vector<4x512xf32>
    %c0_1 = arith.constant 0 : index
    %c0_2 = arith.constant 0 : index
    %1 = vector.load %arg2[%c0_1, %c0_2] : memref<4x512xf32, #tpu.memory_space<vmem>>, vector<4x512xf32>
    %cst = arith.constant 1.000000e+00 : f32
    %2 = vector.broadcast %cst : f32 to vector<4x512xf32>
    %3 = arith.cmpf oeq, %1, %2 : vector<4x512xf32>
    %cst_3 = arith.constant 1.000000e+00 : f32
    %4 = vector.broadcast %cst_3 : f32 to vector<4x512xf32>
    %5 = arith.cmpf olt, %1, %4 : vector<4x512xf32>
    %cst_4 = arith.constant 1.000000e-10 : f32
    %6 = vector.broadcast %cst_4 : f32 to vector<4x512xf32>
    %7 = arith.addf %0, %6 : vector<4x512xf32>
    %cst_5 = arith.constant 1.000000e+00 : f32
    %8 = vector.broadcast %cst_5 : f32 to vector<4x512xf32>
    %9 = arith.subf %8, %0 : vector<4x512xf32>
    %cst_6 = arith.constant 1.000000e-10 : f32
    %10 = vector.broadcast %cst_6 : f32 to vector<4x512xf32>
    %11 = arith.addf %9, %10 : vector<4x512xf32>
    %12 = arith.select %3, %7, %11 : vector<4x512xi1>, vector<4x512xf32>
    %13 = math.log %12 : vector<4x512xf32>
    %cst_7 = arith.constant 1.000000e+00 : f32
    %14 = vector.broadcast %cst_7 : f32 to vector<4x512xf32>
    %15 = arith.subf %14, %0 : vector<4x512xf32>
    %16 = arith.select %3, %15, %0 : vector<4x512xi1>, vector<4x512xf32>
    %17 = arith.mulf %16, %16 : vector<4x512xf32>
    %cst_8 = arith.constant 1.000000e+00 : f32
    %18 = vector.broadcast %cst_8 : f32 to vector<4x512xf32>
    %19 = arith.subf %18, %1 : vector<4x512xf32>
    %20 = arith.mulf %19, %19 : vector<4x512xf32>
    %21 = arith.mulf %20, %20 : vector<4x512xf32>
    %cst_9 = arith.constant 0.000000e+00 : f32
    %22 = vector.broadcast %cst_9 : f32 to vector<4x512xf32>
    %23 = arith.select %5, %21, %22 : vector<4x512xi1>, vector<4x512xf32>
    %cst_10 = arith.constant 1.000000e+00 : f32
    %24 = vector.broadcast %cst_10 : f32 to vector<4x512xf32>
    %25 = arith.select %3, %24, %23 : vector<4x512xi1>, vector<4x512xf32>
    %cst_11 = arith.constant 0.000000e+00 : f32
    %26 = vector.broadcast %cst_11 : f32 to vector<4x512xf32>
    %27 = arith.subf %26, %13 : vector<4x512xf32>
    %28 = arith.mulf %27, %17 : vector<4x512xf32>
    %29 = arith.mulf %28, %25 : vector<4x512xf32>
    %cst_12 = arith.constant 0.000000e+00 : f32
    %30 = vector.broadcast %cst_12 : f32 to vector<4x512xf32>
    %31 = arith.select %3, %29, %30 : vector<4x512xi1>, vector<4x512xf32>
    %cst_13 = arith.constant dense<0.000000e+00> : vector<512xf32>
    %32 = vector.multi_reduction <add>, %31, %cst_13 [0] : vector<4x512xf32> to vector<512xf32>
    %33 = vector.shape_cast %32 : vector<512xf32> to vector<1x512xf32>
    %cst_14 = arith.constant 0.000000e+00 : f32
    %34 = vector.broadcast %cst_14 : f32 to vector<4x512xf32>
    %35 = arith.select %3, %34, %29 : vector<4x512xi1>, vector<4x512xf32>
    %cst_15 = arith.constant dense<0.000000e+00> : vector<512xf32>
    %36 = vector.multi_reduction <add>, %35, %cst_15 [0] : vector<4x512xf32> to vector<512xf32>
    %37 = vector.shape_cast %36 : vector<512xf32> to vector<1x512xf32>
    %38 = arith.extui %3 : vector<4x512xi1> to vector<4x512xi32>
    %39 = arith.sitofp %38 : vector<4x512xi32> to vector<4x512xf32>
    %cst_16 = arith.constant dense<0.000000e+00> : vector<512xf32>
    %40 = vector.multi_reduction <add>, %39, %cst_16 [0] : vector<4x512xf32> to vector<512xf32>
    %41 = vector.shape_cast %40 : vector<512xf32> to vector<1x512xf32>
    %c0_17 = arith.constant 0 : index
    %c0_18 = arith.constant 0 : index
    %c0_19 = arith.constant 0 : index
    %42 = vector.load %arg3[%c0_17, %c0_18, %c0_19] : memref<1x3x512xf32, #tpu.memory_space<vmem>>, vector<1x1x512xf32>
    %43 = vector.shape_cast %42 : vector<1x1x512xf32> to vector<1x512xf32>
    %44 = vector.shape_cast %33 : vector<1x512xf32> to vector<1x1x512xf32>
    tpu.vector_store %arg3[%c0_17, %c0_18, %c0_19], %44 {strides = array<i32>} : memref<1x3x512xf32, #tpu.memory_space<vmem>>, vector<1x1x512xf32>,
    %c0_20 = arith.constant 0 : index
    %c1 = arith.constant 1 : index
    %c0_21 = arith.constant 0 : index
    %45 = vector.load %arg3[%c0_20, %c1, %c0_21] : memref<1x3x512xf32, #tpu.memory_space<vmem>>, vector<1x1x512xf32>
    %46 = vector.shape_cast %45 : vector<1x1x512xf32> to vector<1x512xf32>
    %47 = vector.shape_cast %37 : vector<1x512xf32> to vector<1x1x512xf32>
    tpu.vector_store %arg3[%c0_20, %c1, %c0_21], %47 {strides = array<i32>} : memref<1x3x512xf32, #tpu.memory_space<vmem>>, vector<1x1x512xf32>,
    %c0_22 = arith.constant 0 : index
    %c2 = arith.constant 2 : index
    %c0_23 = arith.constant 0 : index
    %48 = vector.load %arg3[%c0_22, %c2, %c0_23] : memref<1x3x512xf32, #tpu.memory_space<vmem>>, vector<1x1x512xf32>
    %49 = vector.shape_cast %48 : vector<1x1x512xf32> to vector<1x512xf32>
    %50 = vector.shape_cast %41 : vector<1x512xf32> to vector<1x1x512xf32>
    tpu.vector_store %arg3[%c0_22, %c2, %c0_23], %50 {strides = array<i32>} : memref<1x3x512xf32, #tpu.memory_space<vmem>>, vector<1x1x512xf32>,
    return
  }
  func.func @transform_0(%arg0: i32) -> (i32, i32) {
    %c0_i32 = arith.constant 0 : i32
    %c0_i32_0 = arith.constant 0 : i32
    return %arg0, %c0_i32 : i32, i32
  }
  func.func @transform_1(%arg0: i32) -> (i32, i32) {
    %c0_i32 = arith.constant 0 : i32
    %c0_i32_0 = arith.constant 0 : i32
    return %arg0, %c0_i32 : i32, i32
  }
  func.func @transform_2(%arg0: i32) -> (i32, i32, i32) {
    %c0_i32 = arith.constant 0 : i32
    %c0_i32_0 = arith.constant 0 : i32
    %c0_i32_1 = arith.constant 0 : i32
    return %arg0, %c0_i32, %c0_i32_0 : i32, i32, i32
  }
}

</mosaic_0001>

<bundles_post_ra>
// kernel: tpu_custom_call.1
= control target key start
LH: loop header
LB: loop body
LE: loop exit
PB: predicated region body
PF: predicated region fallthrough
CT: control target
= control target key end

     0   :  { %7 = vsyncpa [#allocation3], 0  ;;  %s479_s0 = inlined_call_operand.hbm [shape: f32[4,512], index: 0, kind: input, shape index: {}]   ;;  %s480_s1 = inlined_call_operand.hbm [shape: f32[4,512], index: 1, kind: input, shape index: {}]   ;;  %s481_s2 = inlined_call_operand.vmem [shape: f32[1,3,512], index: 2, kind: output, shape index: {}]  }
   0x1   :  { %8 = vsyncpa [#allocation5], 0  ;;  %s348_s9 = smov [#allocation2]   ;;  %s349_s11 = smov [#allocation4]  }
   0x2   :  { %s15_s10 = sshll.u32 %s348_s9, 4  ;;  %s25_s12 = sshll.u32 %s349_s11, 4  ;;  %s16_s10 = int_to_ptr.vmem [resolvable:$true] %s15_s10  ;;  %s26_s12 = int_to_ptr.vmem [resolvable:$true] %s25_s12 }
   0x3   :  { %s300_s15 = scalar_lea.hbm %s479_s0, 256 }
   0x4   :  { %p301_p0 = scmp.ne.s32.totalorder %s479_s0, %s300_s15  ;;  %p304_p1 = scmp.lt.u32.totalorder %s300_s15, %s479_s0 }
   0x6   :  { %p306_p2 = pnand %p304_p1, %p301_p0 }
   0x8   :  { %309 = shalt.err (!%p306_p2)
}
   0x9   :  { %s310_s20 = scalar_lea.vmem %s16_s10, 256  ;;  %p315_p4 = scmp.lt.s32.totalorder %s16_s10, %s16_s10 }
   0xa   :  { %p311_p3 = scmp.ne.s32.totalorder %s16_s10, %s310_s20  ;;  %p316_p5 = scmp.lt.s32.totalorder %s310_s20, %s310_s20 }
   0xc   :  { %p317_p6 = por %p316_p5, %p315_p4 }
   0xe   :  { %p318_p7 = pnand %p317_p6, %p311_p3 }
  0x10   :  { %321 = shalt.err (!%p318_p7)
}
  0x11   :  { %18 = dma.hbm_to_vmem [thread:$0]  %s479_s0, 256, %s16_s10, [#allocation3]  }
  0x12   :  { %s322_s25 = scalar_lea.hbm %s480_s1, 256 }
  0x13   :  { %p323_p8 = scmp.ne.s32.totalorder %s480_s1, %s322_s25  ;;  %p326_p9 = scmp.lt.u32.totalorder %s322_s25, %s480_s1 }
  0x15   :  { %p328_p10 = pnand %p326_p9, %p323_p8 }
  0x17   :  { %331 = shalt.err (!%p328_p10)
}
  0x18   :  { %s332_s30 = scalar_lea.vmem %s26_s12, 256  ;;  %p337_p12 = scmp.lt.s32.totalorder %s26_s12, %s26_s12 }
  0x19   :  { %p333_p11 = scmp.ne.s32.totalorder %s26_s12, %s332_s30  ;;  %p338_p13 = scmp.lt.s32.totalorder %s332_s30, %s332_s30 }
  0x1b   :  { %p339_p0 = por %p338_p13, %p337_p12 }
  0x1d   :  { %p340_p1 = pnand %p339_p0, %p333_p11 }
  0x1f   :  { %343 = shalt.err (!%p340_p1)
}
  0x20   :  { %28 = dma.hbm_to_vmem [thread:$0]  %s480_s1, 256, %s26_s12, [#allocation5]  }
  0x21   :  { %344 = dma.done.wait [#allocation3], 256  }
  0x22   :  { %345 = vsyncadd [#allocation3], 4294967040 }
  0x23   :  { %346 = dma.done.wait [#allocation5], 256  }
  0x24   :  { %347 = vsyncadd [#allocation5], 4294967040  ;;  %v35_v0 = vld [vmem:[#allocation2] sm:$0xff]  ;;  %v36_v1 = vld [vmem:[#allocation2 + $0x8] sm:$0xff]  ;;  %v350_v11 = vmov 0.0   ;;  %vm83_vm2 = vcmask 1043456   ;;  %v195_v26 = vlaneseq }
  0x25   :  { %v391_v2 = vld [vmem:[#allocation4] sm:$0xff]  ;;  %v393_v3 = vld [vmem:[#allocation4 + $0x8] sm:$0xff]  ;;  %v43_v4 = vadd.f32 1e-10, %v35_v0  ;;  %v45_v5 = vsub.f32 1.0, %v35_v0  ;;  %v46_v7 = vsub.f32 1.0, %v36_v1 }
  0x26   :  { %vm39_vm0 = vcmp.eq.f32.partialorder %v391_v2, 1.0  ;;  %v44_v6 = vadd.f32 1e-10, %v36_v1  ;;  %vm40_vm1 = vcmp.eq.f32.partialorder %v393_v3, 1.0  ;;  %v59_v10 = vsub.f32 1.0, %v391_v2 }
  0x27   :  { %v47_v8 = vadd.f32 1e-10, %v45_v5  ;;  %v48_v9 = vadd.f32 1e-10, %v46_v7  ;;  %v288_v12 = vsel %vm39_vm0, 1.0, %v350_v11  ;;  %v60_v14 = vsub.f32 1.0, %v393_v3 }
  0x28   :  { %v289_v16 = vsel %vm40_vm1, 1.0, %v350_v11  ;;  %v154_v17 = vcombine.high %v288_v12, %v288_v12  ;;  %v61_v19 = vmul.f32 %v59_v10, %v59_v10  ;;  %v158_v20 = vsel %vm83_vm2, %v288_v12, 0.0 }
  0x29   :  { %v49_v13 = vsel %vm39_vm0, %v43_v4, %v47_v8  ;;  %v50_v15 = vsel %vm40_vm1, %v44_v6, %v48_v9  ;;  %v155_v18 = vcombine.high %v289_v16, %v289_v16  ;;  %v172_v22 = vsel %vm83_vm2, %v289_v16, 0.0 }
  0x2a   :  { %296 = vlog2.f32 %v49_v13  ;;  %v165_v21 = vsel %vm83_vm2, %v154_v17, 0.0  ;;  %v159_v23 = vrot.slane %v158_v20, 4  ;;  %v62_v25 = vmul.f32 %v60_v14, %v60_v14 }
  0x2b   :  { %298 = vlog2.f32 %v50_v15  ;;  %v166_v24 = vrot.slane %v165_v21, 4  ;;  %v173_v27 = vrot.slane %v172_v22, 4  ;;  %v179_v28 = vsel %vm83_vm2, %v155_v18, 0.0 }
  0x2c   :  { %v160_v29 = vadd.f32 %v159_v23, %v158_v20  ;;  %v180_v31 = vrot.slane %v179_v28, 4  ;;  %vm41_vm3 = vcmp.lt.f32.partialorder %v391_v2, 1.0  ;;  %v63_v32 = vmul.f32 %v61_v19, %v61_v19 }
  0x2d   :  { %v167_v30 = vadd.f32 %v166_v24, %v165_v21  ;;  %v351_v33 = vmov 1966171168   ;;  %v174_v35 = vadd.f32 %v173_v27, %v172_v22  ;;  %v55_v36 = vsel %vm39_vm0, %v45_v5, %v35_v0 }
  0x2e   :  { %v193_v34 = vunpack.c.l.s4 %v351_v33  ;;  %v161_v37 = vrot.slane %v160_v29, 2  ;;  %v181_v39 = vadd.f32 %v180_v31, %v179_v28  ;;  %vm42_vm4 = vcmp.lt.f32.partialorder %v393_v3, 1.0 }
  0x2f   :  { %v168_v38 = vrot.slane %v167_v30, 2  ;;  %v64_v40 = vmul.f32 %v62_v25, %v62_v25  ;;  %v196_v41 = vshrl.u32 %v195_v26, 7  ;;  %v175_v42 = vrot.slane %v174_v35, 2 }
  0x30   :  { %v56_v43 = vsel %vm40_vm1, %v46_v7, %v36_v1  ;;  %v162_v44 = vadd.f32 %v161_v37, %v160_v29  ;;  %v182_v46 = vrot.slane %v181_v39, 2  ;;  %v57_v48 = vmul.f32 %v55_v36, %v55_v36 }
  0x31   :  { %v169_v45 = vadd.f32 %v168_v38, %v167_v30  ;;  %v65_v49 = vsel %vm41_vm3, %v63_v32, 0.0  ;;  %v194_v50 = vunpack.c.0.s8 %v193_v34  ;;  %v176_v51 = vadd.f32 %v175_v42, %v174_v35 }
  0x32   :  { %v163_v54 = vrot.slane %v162_v44, 1  ;;  %v183_v56 = vadd.f32 %v182_v46, %v181_v39  ;;  %v58_v58 = vmul.f32 %v56_v43, %v56_v43  ;;  %v66_v59 = vsel %vm42_vm4, %v64_v40, 0.0 }
  0x33   :  { %v170_v55 = vrot.slane %v169_v45, 1  ;;  %v177_v60 = vrot.slane %v176_v51, 1  ;;  %v67_v1 = vsel %vm39_vm0, 1.0, %v65_v49  ;;  %v424_v5 = vsub.s32 %v194_v50, %v196_v41 }
  0x34   :  { %v297_v47 = vpop.eup %296  ;;  %v164_v62 = vadd.f32 %v163_v54, %v162_v44  ;;  %v184_v0 = vrot.slane %v183_v56, 1  ;;  %v68_v7 = vsel %vm40_vm1, 1.0, %v66_v59  ;;  %vm453_vm5 = vcmp.lt.s32.totalorder %v195_v26, 512 }
  0x35   :  { %v299_v52 = vpop.eup %298  ;;  %v52_v53 = vmul.f32 0.6931472, %v297_v47  ;;  %v171_v63 = vadd.f32 %v170_v55, %v169_v45  ;;  %v178_v6 = vadd.f32 %v177_v60, %v176_v51 }
  0x36   :  { %v54_v57 = vmul.f32 0.6931472, %v299_v52  ;;  %v185_v9 = vadd.f32 %v184_v0, %v183_v56 }
  0x37   :  { %v69_v61 = vsub.f32 0.0, %v52_v53  ;;  %v255_v10 = vcombine.low %v164_v62, %v171_v63 }
  0x38   :  { %v70_v4 = vsub.f32 0.0, %v54_v57  ;;  %v256_v13 = vcombine.low %v178_v6, %v185_v9 }
  0x39   :  { %v71_v8 = vmul.f32 %v69_v61, %v57_v48  ;;  %v433_v17 = vrot.slane %v255_v10, %v424_v5 }
  0x3a   :  { %v72_v11 = vmul.f32 %v70_v4, %v58_v58  ;;  %v436_v18 = vrot.slane %v256_v13, %v424_v5 }
  0x3b   :  { %v73_v12 = vmul.f32 %v71_v8, %v67_v1 }
  0x3c   :  { %v74_v14 = vmul.f32 %v72_v11, %v68_v7 }
  0x3d   :  { %v75_v15 = vsel %vm39_vm0, %v73_v12, 0.0  ;;  %v112_v16 = vsel %vm39_vm0, 0.0, %v73_v12  ;;  %v271_v12 = vcombine.low %v433_v17, %v436_v18 }
  0x3e   :  { %v76_v19 = vsel %vm40_vm1, %v74_v14, 0.0  ;;  %v79_v20 = vcombine.high %v75_v15, %v75_v15  ;;  %v84_v21 = vsel %vm83_vm2, %v75_v15, 0.0  ;;  %v113_v22 = vsel %vm40_vm1, 0.0, %v74_v14 }
  0x3f   :  { %v80_v23 = vcombine.high %v76_v19, %v76_v19  ;;  %v85_v24 = vrot.slane %v84_v21, 4  ;;  %v98_v2 = vsel %vm83_vm2, %v76_v19, 0.0  ;;  %v116_v25 = vcombine.high %v112_v16, %v112_v16 }
  0x40   :  { %v91_v27 = vsel %vm83_vm2, %v79_v20, 0.0  ;;  %v99_v28 = vrot.slane %v98_v2, 4  ;;  %v117_v29 = vcombine.high %v113_v22, %v113_v22  ;;  %v120_v30 = vsel %vm83_vm2, %v112_v16, 0.0 }
  0x41   :  { %v86_v31 = vadd.f32 %v85_v24, %v84_v21  ;;  %v92_v32 = vrot.slane %v91_v27, 4  ;;  %v105_v33 = vsel %vm83_vm2, %v80_v23, 0.0  ;;  %v121_v34 = vrot.slane %v120_v30, 4 }
  0x42   :  { %v100_v35 = vadd.f32 %v99_v28, %v98_v2  ;;  %v106_v36 = vrot.slane %v105_v33, 4  ;;  %v127_v3 = vsel %vm83_vm2, %v116_v25, 0.0  ;;  %v134_v37 = vsel %vm83_vm2, %v113_v22, 0.0 }
  0x43   :  { %v87_v38 = vrot.slane %v86_v31, 2  ;;  %v93_v39 = vadd.f32 %v92_v32, %v91_v27  ;;  %v122_v40 = vadd.f32 %v121_v34, %v120_v30  ;;  %v128_v41 = vrot.slane %v127_v3, 4 }
  0x44   :  { %v101_v42 = vrot.slane %v100_v35, 2  ;;  %v107_v43 = vadd.f32 %v106_v36, %v105_v33  ;;  %v135_v44 = vrot.slane %v134_v37, 4  ;;  %v141_v45 = vsel %vm83_vm2, %v117_v29, 0.0 }
  0x45   :  { %v88_v46 = vadd.f32 %v87_v38, %v86_v31  ;;  %v94_v47 = vrot.slane %v93_v39, 2  ;;  %v123_v48 = vrot.slane %v122_v40, 2  ;;  %v129_v49 = vadd.f32 %v128_v41, %v127_v3 }
  0x46   :  { %v102_v50 = vadd.f32 %v101_v42, %v100_v35  ;;  %v108_v51 = vrot.slane %v107_v43, 2  ;;  %v136_v52 = vadd.f32 %v135_v44, %v134_v37  ;;  %v142_v53 = vrot.slane %v141_v45, 4 }
  0x47   :  { %v89_v54 = vrot.slane %v88_v46, 1  ;;  %v95_v55 = vadd.f32 %v94_v47, %v93_v39  ;;  %v124_v56 = vadd.f32 %v123_v48, %v122_v40  ;;  %v130_v57 = vrot.slane %v129_v49, 2 }
  0x48   :  { %v103_v58 = vrot.slane %v102_v50, 1  ;;  %v109_v59 = vadd.f32 %v108_v51, %v107_v43  ;;  %v137_v60 = vrot.slane %v136_v52, 2  ;;  %v143_v61 = vadd.f32 %v142_v53, %v141_v45 }
  0x49   :  { %v90_v62 = vadd.f32 %v89_v54, %v88_v46  ;;  %v96_v63 = vrot.slane %v95_v55, 1  ;;  %v125_v0 = vrot.slane %v124_v56, 1  ;;  %v131_v1 = vadd.f32 %v130_v57, %v129_v49 }
  0x4a   :  { %v104_v4 = vadd.f32 %v103_v58, %v102_v50  ;;  %v110_v6 = vrot.slane %v109_v59, 1  ;;  %v138_v7 = vadd.f32 %v137_v60, %v136_v52  ;;  %v144_v8 = vrot.slane %v143_v61, 2 }
  0x4b   :  { %v97_v9 = vadd.f32 %v96_v63, %v95_v55  ;;  %v126_v10 = vadd.f32 %v125_v0, %v124_v56  ;;  %v132_v11 = vrot.slane %v131_v1, 1  ;;  %v278_v21 = vrot.slane %v271_v12, %v424_v5 }
  0x4c   :  { %v111_v13 = vadd.f32 %v110_v6, %v109_v59  ;;  %v139_v15 = vrot.slane %v138_v7, 1  ;;  %v145_v16 = vadd.f32 %v144_v8, %v143_v61 }
  0x4d   :  { %v190_v19 = vcombine.low %v90_v62, %v97_v9  ;;  %v133_v20 = vadd.f32 %v132_v11, %v131_v1  ;;  %291 = vst.msk [vmem:[%s481_s2 + $0x2] ss:$4 sm:$0xf] %vm453_vm5, %v278_v21 }
  0x4e   :  { %v191_v22 = vcombine.low %v104_v4, %v111_v13  ;;  %v140_v23 = vadd.f32 %v139_v15, %v138_v7  ;;  %v146_v24 = vrot.slane %v145_v16, 1 }
  0x4f   :  { %v198_v2 = vrot.slane %v190_v19, %v424_v5  ;;  %v224_v25 = vcombine.low %v126_v10, %v133_v20 }
  0x50   :  { %v205_v26 = vrot.slane %v191_v22, %v424_v5  ;;  %v147_v17 = vadd.f32 %v146_v24, %v145_v16 }
  0x51   :  { %v232_v28 = vrot.slane %v224_v25, %v424_v5 }
  0x52   :  { %v206_v18 = vcombine.low %v198_v2, %v205_v26  ;;  %v225_v27 = vcombine.low %v140_v23, %v147_v17 }
  0x54   :  { %v213_v29 = vrot.slane %v206_v18, %v424_v5  ;;  %v239_v30 = vrot.slane %v225_v27, %v424_v5 }
  0x56   :  { %219 = vst.msk [vmem:[%s481_s2] ss:$4 sm:$0xf] %vm453_vm5, %v213_v29  ;;  %v240_v31 = vcombine.low %v232_v28, %v239_v30 }
  0x58   :  { %v247_v32 = vrot.slane %v240_v31, %v424_v5 }
  0x5a   :  { %290 = vst.msk [vmem:[%s481_s2 + $0x1] ss:$4 sm:$0xf] %vm453_vm5, %v247_v32 }
  0x5b   :  { %286 = vsyncpa [#allocation3], 1 }
  0x5c   :  { %287 = vsyncpa [#allocation5], 1 }

</bundles_post_ra>
